<compile_context>
chip_gen: v7x
topology: tpu7x:2x2x1
jax: 0.10.0
libtpu: 0.0.40
codegen_flags: <defaults>
</compile_context>

<pallas_src>
import numpy as np

import jax
import jax.numpy as jnp
from jax import lax
from jax.experimental import pallas as pl
from jax.experimental.pallas import tpu as pltpu


# ------------------------------------ fused kernel ------------------------------------
def cbam_kernel(x_ref, w1b_ref, b1b_ref, w2s_ref, b2e_ref, k_ref, bsp_ref, o_ref):
    """One (Bb, C, HW) batch block per grid step (HW lane-dense).

    x_ref   : (Bb, C, HW) input block.
    w1b_ref : (2C, 2h)  block-diag first Linear (shared weights for max / avg pools).
    b1b_ref : (1, 2h)   first-Linear bias (duplicated).
    w2s_ref : (2h, C)   second Linear with the Conv1d(2,1,1) mixing weights folded in.
    b2e_ref : (1, C)    folded second-Linear + Conv1d bias.
    k_ref   : (2*HW, HW) precomputed zero-padded 7x7 conv operator [K_max; K_avg].
    bsp_ref : (1, HW)   spatial-conv bias row.
    o_ref   : (Bb, C, HW) output block (also used to stage xc between the two stages).
    """
    xf = x_ref[...].astype(jnp.float32)                       # (Bb, C, HW)

    def sigmoid(z):
        return 1.0 / (1.0 + jnp.exp(-z))

    # ---------------- channel attention ----------------
    max_p = jnp.max(xf, axis=2)                               # AdaptiveMaxPool2d(1) -> (Bb, C)
    avg_p = jnp.mean(xf, axis=2)                              # AdaptiveAvgPool2d(1) -> (Bb, C)
    pools = jnp.concatenate([max_p, avg_p], axis=1)           # (Bb, 2C)

    h = jnp.dot(pools, w1b_ref[...], preferred_element_type=jnp.float32) + b1b_ref[...]
    h = jnp.maximum(h, 0.0)                                   # ReLU -> (Bb, 2h)
    z = jnp.dot(h, w2s_ref[...], preferred_element_type=jnp.float32) + b2e_ref[...]
    att_c = sigmoid(z)                                        # (Bb, C)

    # Stage xc through o_ref (keeps both x and xc from being fully vreg-resident).
    o_ref[...] = (xf * att_c[:, :, None]).astype(o_ref.dtype)

    # ---------------- spatial attention ----------------
    xc = o_ref[...].astype(jnp.float32)                       # staged read
    maxf = jnp.max(xc, axis=1)                                # channel max  -> (Bb, HW)
    avgf = jnp.mean(xc, axis=1)                               # channel mean -> (Bb, HW)
    feats = jnp.concatenate([maxf, avgf], axis=1).astype(k_ref.dtype)   # (Bb, 2*HW)
    conv = (jnp.dot(feats, k_ref[...], preferred_element_type=jnp.float32)
            + bsp_ref[...])                                   # zero-padded 7x7 conv -> (Bb, HW)
    att_s = sigmoid(conv)                                     # (Bb, HW)

    o_ref[...] = (o_ref[...].astype(jnp.float32)
                  * att_s[:, None, :]).astype(o_ref.dtype)    # lane-dense final store


# ----------------------------- host-side helpers (trace time) -----------------------------
def _build_spatial_operator(w_sp, H, W, k):
    """Linear operator K with conv_out[p] = sum_c sum_q feat[c, q] * K[c, q, p].

    q = (i', j') flattened input index, p = (i, j) flattened output index and
    K[c, (i',j'), (i,j)] = w_sp[c, i'-i+pad, j'-j+pad] when both offsets lie in [0, k).
    Fully vectorized; safe under jit.
    """
    pad = k // 2
    di = jnp.arange(H)[:, None] - jnp.arange(H)[None, :] + pad      # (Hq, Hp)
    dj = jnp.arange(W)[:, None] - jnp.arange(W)[None, :] + pad      # (Wq, Wp)
    mi = (di >= 0) & (di < k)
    mj = (dj >= 0) & (dj < k)
    diC = jnp.clip(di, 0, k - 1)
    djC = jnp.clip(dj, 0, k - 1)
    Kc = w_sp[:, diC[:, :, None, None], djC[None, None, :, :]]      # (2, Hq, Hp, Wq, Wp)
    mask = (mi[:, :, None, None] & mj[None, None, :, :]).astype(w_sp.dtype)
    Kc = Kc * mask
    # (c, i', j', i, j) -> (2, HW, HW)
    return Kc.transpose(0, 1, 3, 2, 4).reshape(2, H * W, H * W)


def _vmem_capacity_bytes():
    try:
        info = pltpu.get_tpu_info()
        cap = getattr(info, "vmem_capacity_bytes", None)
        if cap:
            return int(cap)
    except Exception:
        pass
    return 64 << 20  # safe lower bound across v5e / v6e / v7x


def _num_tensorcores():
    try:
        kind = jax.devices()[0].device_kind.lower()
        if "v7" in kind or "7x" in kind:
            return 2
    except Exception:
        pass
    return 1


def _pick_block_batch(B, per_sample_bytes, budget_bytes, num_tc):
    """Largest divisor of B whose 2x(in+out) double-buffered blocks fit the budget.
    Only on multi-TensorCore chips do we (mildly) prefer a grid length that shards."""
    divisors = [d for d in range(1, B + 1) if B % d == 0]
    fits = [d for d in divisors if 4 * d * per_sample_bytes <= budget_bytes]
    if not fits:
        return 1
    best = max(fits)
    if num_tc >= 2:
        multi = [d for d in fits if (B // d) % num_tc == 0]
        if multi and 2 * max(multi) >= best:     # don't shrink blocks >2x for parallelism
            return max(multi)
    return best


# --------------------------------------- wrapper ---------------------------------------
def _cbam_pallas_impl(x, p):
    B, C, H, W = x.shape
    HW = H * W
    hidden = p["w1"].shape[0]
    ksz = p["w_sp"].shape[-1]
    x_itemsize = jnp.dtype(x.dtype).itemsize
    f32 = jnp.float32

    # ---- fold Conv1d(2,1,1) mixing + biases into the MLP weights (trace time) ----
    w1t = p["w1"].T.astype(f32)                                      # (C, h)
    zblk = jnp.zeros_like(w1t)
    w1b = jnp.concatenate(
        [jnp.concatenate([w1t, zblk], axis=1),
         jnp.concatenate([zblk, w1t], axis=1)], axis=0)              # (2C, 2h) block-diag
    b1b = jnp.concatenate([p["b1"], p["b1"]]).reshape(1, 2 * hidden).astype(f32)
    w2t = p["w2"].T.astype(f32)                                      # (h, C)
    w2s = jnp.concatenate([p["sub_w"][0] * w2t,
                           p["sub_w"][1] * w2t], axis=0).astype(f32)  # (2h, C)
    b2e = ((p["sub_w"][0] + p["sub_w"][1]) * p["b2"]
           + p["sub_b"]).reshape(1, C).astype(f32)

    # ---- dense spatial 7x7 conv operator (bf16 only once it becomes VMEM-heavy) ----
    k_bytes_f32 = 2 * HW * HW * 4
    k_dtype = f32 if k_bytes_f32 <= (8 << 20) else jnp.bfloat16
    Kop = _build_spatial_operator(p["w_sp"].astype(f32), H, W, ksz)
    Kop = Kop.reshape(2 * HW, HW).astype(k_dtype)                    # [K_max; K_avg]
    bsp = jnp.full((1, HW), p["b_sp"], dtype=f32)

    # ---- generation-aware block sizing + VMEM budget ----
    vmem_cap = _vmem_capacity_bytes()
    usable = min(int(0.8 * vmem_cap), 96 << 20)
    resident = (Kop.size * jnp.dtype(k_dtype).itemsize
                + (w1b.size + b1b.size + w2s.size + b2e.size + bsp.size) * 4)
    budget = max(usable - 2 * resident, 1 << 20)
    per_sample = C * HW * x_itemsize
    Bb = _pick_block_batch(B, per_sample, budget, _num_tensorcores())
    grid = (B // Bb,)

    vmem_need = 4 * Bb * per_sample + 2 * resident + (4 << 20)
    cap_limit = max(int(0.9 * vmem_cap), vmem_need)
    vmem_limit = int(min(max(vmem_need, 32 << 20), cap_limit))

    flops = int(B * (2 * (2 * HW) * HW)                              # spatial contraction
                + B * (2 * (2 * C) * (2 * hidden) + 2 * (2 * hidden) * C)   # channel MLP
                + 6 * B * C * HW)                                    # elementwise
    cost = pl.CostEstimate(
        flops=flops,
        transcendentals=int(B * (C + HW)),
        bytes_accessed=int(2 * B * C * HW * x_itemsize + resident))

    x2 = x.reshape(B, C, HW)                                         # keep input dtype

    out = pl.pallas_call(
        cbam_kernel,
        out_shape=jax.ShapeDtypeStruct((B, C, HW), x.dtype),
        grid=grid,
        in_specs=[
            pl.BlockSpec((Bb, C, HW), lambda g: (g, 0, 0)),          # x block
            pl.BlockSpec((2 * C, 2 * hidden), lambda g: (0, 0)),     # W1 block-diag
            pl.BlockSpec((1, 2 * hidden), lambda g: (0, 0)),         # b1 (dup)
            pl.BlockSpec((2 * hidden, C), lambda g: (0, 0)),         # W2 stacked/scaled
            pl.BlockSpec((1, C), lambda g: (0, 0)),                  # folded bias
            pl.BlockSpec((2 * HW, HW), lambda g: (0, 0)),            # conv operator
            pl.BlockSpec((1, HW), lambda g: (0, 0)),                 # spatial bias row
        ],
        out_specs=pl.BlockSpec((Bb, C, HW), lambda g: (g, 0, 0)),
        compiler_params=pltpu.CompilerParams(
            dimension_semantics=("parallel",),
            vmem_limit_bytes=vmem_limit),
        cost_estimate=cost,
    )(x2, w1b, b1b, w2s, b2e, Kop, bsp)

    return out.reshape(B, C, H, W)


cbam_pallas = jax.jit(_cbam_pallas_impl)


# --------------------------- deterministic parameter init (synthetic) ---------------------------
def init_params(key, C, scale=16, k_spatial=7):
    hidden = C // scale
    ks = jax.random.split(key, 8)

    def u(k, shape, fan_in):
        bound = 1.0 / np.sqrt(fan_in)
        return jax.random.uniform(k, shape, jnp.float32, -bound, bound)

    return dict(
        w1=u(ks[0], (hidden, C), C),
        b1=u(ks[1], (hidden,), C),
        w2=u(ks[2], (C, hidden), hidden),
        b2=u(ks[3], (C,), hidden),
        sub_w=u(ks[4], (2,), 2),                     # Conv1d(2,1,1) weights
        sub_b=u(ks[5], (), 2),                       # Conv1d bias
        w_sp=u(ks[6], (2, k_spatial, k_spatial), 2 * k_spatial * k_spatial),  # Conv2d(2,1,7,7)
        b_sp=u(ks[7], (), 2 * k_spatial * k_spatial),
    )


# ------------------------------------ pure-JAX reference ------------------------------------
def cbam_reference(x, p):
    mx = jnp.max(x, axis=(2, 3))
    av = jnp.mean(x, axis=(2, 3))

    def mlp(v):
        h = jnp.maximum(jnp.dot(v, p["w1"].T, precision=lax.Precision.HIGHEST) + p["b1"], 0.0)
        return jnp.dot(h, p["w2"].T, precision=lax.Precision.HIGHEST) + p["b2"]

    z = p["sub_w"][0] * mlp(mx) + p["sub_w"][1] * mlp(av) + p["sub_b"]
    att_c = jax.nn.sigmoid(z)
    xc = x * att_c[:, :, None, None]

    mf = jnp.max(xc, axis=1, keepdims=True)
    af = jnp.mean(xc, axis=1, keepdims=True)
    feat = jnp.concatenate([mf, af], axis=1)
    conv = lax.conv_general_dilated(
        feat, p["w_sp"][None, :, :, :], window_strides=(1, 1),
        padding=((3, 3), (3, 3)),
        dimension_numbers=("NCHW", "OIHW", "NCHW"),
        precision=lax.Precision.HIGHEST)
    att_s = jax.nn.sigmoid(conv + p["b_sp"])
    return xc * att_s


if __name__ == "__main__":
    key = jax.random.PRNGKey(0)
    kx, kp = jax.random.split(key)

    B, C, H, W = 2, 32, 16, 16           # channel_scale=16 -> hidden = 2
    x = jax.random.normal(kx, (B, C, H, W), jnp.float32)
    params = init_params(kp, C, scale=16, k_spatial=7)

    out = jax.block_until_ready(cbam_pallas(x, params))
    ref = jax.block_until_ready(cbam_reference(x, params))

    assert out.shape == (B, C, H, W) and out.dtype == x.dtype
    np.testing.assert_allclose(np.asarray(out), np.asarray(ref), rtol=2e-3, atol=2e-3)
    print("KERNEL_OK")
</pallas_src>

<mosaic_0001>
module attributes {stable_mosaic.version = 11 : i64} {
  func.func @cbam_kernel(%arg0: i32, %arg1: memref<2x32x256xf32, #tpu.memory_space<vmem>>, %arg2: memref<64x4xf32, #tpu.memory_space<vmem>>, %arg3: memref<1x4xf32, #tpu.memory_space<vmem>>, %arg4: memref<4x32xf32, #tpu.memory_space<vmem>>, %arg5: memref<1x32xf32, #tpu.memory_space<vmem>>, %arg6: memref<512x256xf32, #tpu.memory_space<vmem>>, %arg7: memref<1x256xf32, #tpu.memory_space<vmem>>, %arg8: memref<2x32x256xf32, #tpu.memory_space<vmem>>) attributes {dimension_semantics = [#tpu.dimension_semantics<parallel>], iteration_bounds = array<i64: 1>, scalar_prefetch = 0 : i64, scratch_operands = 0 : i64, tpu.core_type = #tpu.core_type<tc>, window_params = [{transform_indices = @transform_0, window_bounds = array<i64: 2, 32, 256>}, {pipeline_mode = #tpu.pipeline_mode<synchronous>, transform_indices = @transform_1, window_bounds = array<i64: 64, 4>}, {pipeline_mode = #tpu.pipeline_mode<synchronous>, transform_indices = @transform_2, window_bounds = array<i64: 1, 4>}, {pipeline_mode = #tpu.pipeline_mode<synchronous>, transform_indices = @transform_3, window_bounds = array<i64: 4, 32>}, {pipeline_mode = #tpu.pipeline_mode<synchronous>, transform_indices = @transform_4, window_bounds = array<i64: 1, 32>}, {pipeline_mode = #tpu.pipeline_mode<synchronous>, transform_indices = @transform_5, window_bounds = array<i64: 512, 256>}, {pipeline_mode = #tpu.pipeline_mode<synchronous>, transform_indices = @transform_6, window_bounds = array<i64: 1, 256>}, {transform_indices = @transform_7, window_bounds = array<i64: 2, 32, 256>}]} {
    %c0 = arith.constant 0 : index
    %c0_0 = arith.constant 0 : index
    %c0_1 = arith.constant 0 : index
    %0 = vector.load %arg1[%c0, %c0_0, %c0_1] : memref<2x32x256xf32, #tpu.memory_space<vmem>>, vector<2x32x256xf32>
    %cst = arith.constant dense<0xFF800000> : vector<2x32xf32>
    %1 = vector.multi_reduction <maximumf>, %0, %cst [2] : vector<2x32x256xf32> to vector<2x32xf32>
    %cst_2 = arith.constant dense<0.000000e+00> : vector<2x32xf32>
    %2 = vector.multi_reduction <add>, %0, %cst_2 [2] : vector<2x32x256xf32> to vector<2x32xf32>
    %cst_3 = arith.constant 2.560000e+02 : f32
    %3 = vector.broadcast %cst_3 : f32 to vector<2x32xf32>
    %4 = arith.divf %2, %3 : vector<2x32xf32>
    %5 = tpu.concatenate %1, %4 in 1 : vector<2x32xf32>, vector<2x32xf32> -> vector<2x64xf32>
    %c0_4 = arith.constant 0 : index
    %c0_5 = arith.constant 0 : index
    %6 = vector.load %arg2[%c0_4, %c0_5] : memref<64x4xf32, #tpu.memory_space<vmem>>, vector<64x4xf32>
    %cst_6 = arith.constant dense<0.000000e+00> : vector<2x4xf32>
    %7 = tpu.matmul %5, %6, %cst_6 {dimension_numbers = #tpu.dot_dimension_numbers<[1], [0], [0], [1], [0, 0, 1, 1], [], []>} : vector<2x64xf32>, vector<64x4xf32>, vector<2x4xf32> -> vector<2x4xf32>
    %c0_7 = arith.constant 0 : index
    %c0_8 = arith.constant 0 : index
    %8 = vector.load %arg3[%c0_7, %c0_8] : memref<1x4xf32, #tpu.memory_space<vmem>>, vector<1x4xf32>
    %9 = vector.broadcast %8 : vector<1x4xf32> to vector<2x4xf32>
    %10 = arith.addf %7, %9 : vector<2x4xf32>
    %cst_9 = arith.constant 0.000000e+00 : f32
    %11 = vector.broadcast %cst_9 : f32 to vector<2x4xf32>
    %12 = arith.maximumf %10, %11 : vector<2x4xf32>
    %c0_10 = arith.constant 0 : index
    %c0_11 = arith.constant 0 : index
    %13 = vector.load %arg4[%c0_10, %c0_11] : memref<4x32xf32, #tpu.memory_space<vmem>>, vector<4x32xf32>
    %cst_12 = arith.constant dense<0.000000e+00> : vector<2x32xf32>
    %14 = tpu.matmul %12, %13, %cst_12 {dimension_numbers = #tpu.dot_dimension_numbers<[1], [0], [0], [1], [0, 0, 1, 1], [], []>} : vector<2x4xf32>, vector<4x32xf32>, vector<2x32xf32> -> vector<2x32xf32>
    %c0_13 = arith.constant 0 : index
    %c0_14 = arith.constant 0 : index
    %15 = vector.load %arg5[%c0_13, %c0_14] : memref<1x32xf32, #tpu.memory_space<vmem>>, vector<1x32xf32>
    %16 = vector.broadcast %15 : vector<1x32xf32> to vector<2x32xf32>
    %17 = arith.addf %14, %16 : vector<2x32xf32>
    %cst_15 = arith.constant 0.000000e+00 : f32
    %18 = vector.broadcast %cst_15 : f32 to vector<2x32xf32>
    %19 = arith.subf %18, %17 : vector<2x32xf32>
    %20 = math.exp %19 : vector<2x32xf32>
    %cst_16 = arith.constant 1.000000e+00 : f32
    %21 = vector.broadcast %cst_16 : f32 to vector<2x32xf32>
    %22 = arith.addf %21, %20 : vector<2x32xf32>
    %cst_17 = arith.constant 1.000000e+00 : f32
    %23 = vector.broadcast %cst_17 : f32 to vector<2x32xf32>
    %24 = arith.divf %23, %22 : vector<2x32xf32>
    %25 = vector.shape_cast %24 : vector<2x32xf32> to vector<2x32x1xf32>
    %26 = vector.broadcast %25 : vector<2x32x1xf32> to vector<2x32x256xf32>
    %27 = arith.mulf %0, %26 : vector<2x32x256xf32>
    %c0_18 = arith.constant 0 : index
    %c0_19 = arith.constant 0 : index
    %c0_20 = arith.constant 0 : index
    %28 = vector.load %arg8[%c0_18, %c0_19, %c0_20] : memref<2x32x256xf32, #tpu.memory_space<vmem>>, vector<2x32x256xf32>
    tpu.vector_store %arg8[%c0_18, %c0_19, %c0_20], %27 {strides = array<i32>} : memref<2x32x256xf32, #tpu.memory_space<vmem>>, vector<2x32x256xf32>,
    %c0_21 = arith.constant 0 : index
    %c0_22 = arith.constant 0 : index
    %c0_23 = arith.constant 0 : index
    %29 = vector.load %arg8[%c0_21, %c0_22, %c0_23] : memref<2x32x256xf32, #tpu.memory_space<vmem>>, vector<2x32x256xf32>
    %cst_24 = arith.constant dense<0xFF800000> : vector<2x256xf32>
    %30 = vector.multi_reduction <maximumf>, %29, %cst_24 [1] : vector<2x32x256xf32> to vector<2x256xf32>
    %cst_25 = arith.constant dense<0.000000e+00> : vector<2x256xf32>
    %31 = vector.multi_reduction <add>, %29, %cst_25 [1] : vector<2x32x256xf32> to vector<2x256xf32>
    %cst_26 = arith.constant 3.200000e+01 : f32
    %32 = vector.broadcast %cst_26 : f32 to vector<2x256xf32>
    %33 = arith.divf %31, %32 : vector<2x256xf32>
    %34 = tpu.concatenate %30, %33 in 1 : vector<2x256xf32>, vector<2x256xf32> -> vector<2x512xf32>
    %c0_27 = arith.constant 0 : index
    %c0_28 = arith.constant 0 : index
    %35 = vector.load %arg6[%c0_27, %c0_28] : memref<512x256xf32, #tpu.memory_space<vmem>>, vector<512x256xf32>
    %cst_29 = arith.constant dense<0.000000e+00> : vector<2x256xf32>
    %36 = tpu.matmul %34, %35, %cst_29 {dimension_numbers = #tpu.dot_dimension_numbers<[1], [0], [0], [1], [0, 0, 1, 1], [], []>} : vector<2x512xf32>, vector<512x256xf32>, vector<2x256xf32> -> vector<2x256xf32>
    %c0_30 = arith.constant 0 : index
    %c0_31 = arith.constant 0 : index
    %37 = vector.load %arg7[%c0_30, %c0_31] : memref<1x256xf32, #tpu.memory_space<vmem>>, vector<1x256xf32>
    %38 = vector.broadcast %37 : vector<1x256xf32> to vector<2x256xf32>
    %39 = arith.addf %36, %38 : vector<2x256xf32>
    %cst_32 = arith.constant 0.000000e+00 : f32
    %40 = vector.broadcast %cst_32 : f32 to vector<2x256xf32>
    %41 = arith.subf %40, %39 : vector<2x256xf32>
    %42 = math.exp %41 : vector<2x256xf32>
    %cst_33 = arith.constant 1.000000e+00 : f32
    %43 = vector.broadcast %cst_33 : f32 to vector<2x256xf32>
    %44 = arith.addf %43, %42 : vector<2x256xf32>
    %cst_34 = arith.constant 1.000000e+00 : f32
    %45 = vector.broadcast %cst_34 : f32 to vector<2x256xf32>
    %46 = arith.divf %45, %44 : vector<2x256xf32>
    %c0_35 = arith.constant 0 : index
    %c0_36 = arith.constant 0 : index
    %c0_37 = arith.constant 0 : index
    %47 = vector.load %arg8[%c0_35, %c0_36, %c0_37] : memref<2x32x256xf32, #tpu.memory_space<vmem>>, vector<2x32x256xf32>
    %48 = vector.shape_cast %46 : vector<2x256xf32> to vector<2x1x256xf32>
    %49 = vector.broadcast %48 : vector<2x1x256xf32> to vector<2x32x256xf32>
    %50 = arith.mulf %47, %49 : vector<2x32x256xf32>
    %c0_38 = arith.constant 0 : index
    %c0_39 = arith.constant 0 : index
    %c0_40 = arith.constant 0 : index
    %51 = vector.load %arg8[%c0_38, %c0_39, %c0_40] : memref<2x32x256xf32, #tpu.memory_space<vmem>>, vector<2x32x256xf32>
    tpu.vector_store %arg8[%c0_38, %c0_39, %c0_40], %50 {strides = array<i32>} : memref<2x32x256xf32, #tpu.memory_space<vmem>>, vector<2x32x256xf32>,
    return
  }
  func.func @transform_0(%arg0: i32) -> (i32, i32, i32) {
    %c0_i32 = arith.constant 0 : i32
    %c0_i32_0 = arith.constant 0 : i32
    %c0_i32_1 = arith.constant 0 : i32
    return %arg0, %c0_i32, %c0_i32_0 : i32, i32, i32
  }
  func.func @transform_1(%arg0: i32) -> (i32, i32) {
    %c0_i32 = arith.constant 0 : i32
    %c0_i32_0 = arith.constant 0 : i32
    %c0_i32_1 = arith.constant 0 : i32
    return %c0_i32, %c0_i32_0 : i32, i32
  }
  func.func @transform_2(%arg0: i32) -> (i32, i32) {
    %c0_i32 = arith.constant 0 : i32
    %c0_i32_0 = arith.constant 0 : i32
    %c0_i32_1 = arith.constant 0 : i32
    return %c0_i32, %c0_i32_0 : i32, i32
  }
  func.func @transform_3(%arg0: i32) -> (i32, i32) {
    %c0_i32 = arith.constant 0 : i32
    %c0_i32_0 = arith.constant 0 : i32
    %c0_i32_1 = arith.constant 0 : i32
    return %c0_i32, %c0_i32_0 : i32, i32
  }
  func.func @transform_4(%arg0: i32) -> (i32, i32) {
    %c0_i32 = arith.constant 0 : i32
    %c0_i32_0 = arith.constant 0 : i32
    %c0_i32_1 = arith.constant 0 : i32
    return %c0_i32, %c0_i32_0 : i32, i32
  }
  func.func @transform_5(%arg0: i32) -> (i32, i32) {
    %c0_i32 = arith.constant 0 : i32
    %c0_i32_0 = arith.constant 0 : i32
    %c0_i32_1 = arith.constant 0 : i32
    return %c0_i32, %c0_i32_0 : i32, i32
  }
  func.func @transform_6(%arg0: i32) -> (i32, i32) {
    %c0_i32 = arith.constant 0 : i32
    %c0_i32_0 = arith.constant 0 : i32
    %c0_i32_1 = arith.constant 0 : i32
    return %c0_i32, %c0_i32_0 : i32, i32
  }
  func.func @transform_7(%arg0: i32) -> (i32, i32, i32) {
    %c0_i32 = arith.constant 0 : i32
    %c0_i32_0 = arith.constant 0 : i32
    %c0_i32_1 = arith.constant 0 : i32
    return %arg0, %c0_i32, %c0_i32_0 : i32, i32, i32
  }
}

</mosaic_0001>

<bundles_post_ra>
// kernel: _cbam_pallas_impl.1
= control target key start
LH: loop header
LB: loop body
LE: loop exit
PB: predicated region body
PF: predicated region fallthrough
CT: control target
= control target key end

     0   :  { %v1149_v35 = vmov 0.0|0.0   ;;  %vm1150_vm0 = vmmov 0   ;;  %v1151_v45 = vmov 0.0   ;;  %v107_v50 = vlaneseq  ;;  %s1914_s0 = inlined_call_operand.vmem [shape: f32[2,32,256], index: 0, kind: input, shape index: {}]   ;;  %s1915_s1 = inlined_call_operand.vmem [shape: f32[64,4], index: 1, kind: input, shape index: {}]   ;;  %s1916_s3 = inlined_call_operand.vmem [shape: f32[4,32], index: 3, kind: input, shape index: {}]   ;;  %s1917_s2 = inlined_call_operand.vmem [shape: f32[1,4], index: 2, kind: input, shape index: {}]   ;;  %s1918_s5 = inlined_call_operand.vmem [shape: f32[512,256], index: 5, kind: input, shape index: {}]   ;;  %s1919_s4 = inlined_call_operand.vmem [shape: f32[1,32], index: 4, kind: input, shape index: {}]   ;;  %s1920_s6 = inlined_call_operand.vmem [shape: f32[1,256], index: 6, kind: input, shape index: {}]   ;;  %s1921_s7 = inlined_call_operand.vmem [shape: f32[2,32,256], index: 7, kind: output, shape index: {}]  }
   0x1   :  { %v1196_v0 = vld [vmem:[%s1914_s0 + $0x40] sm:$0xff]  ;;  %v1201_v1 = vld [vmem:[%s1914_s0 + $0x48] sm:$0xff]  ;;  %v1218_v5 = vld [vmem:[%s1914_s0 + $0x50] sm:$0xff]  ;;  %989 = vmatprep.subr.bf16.mxu0 %v1149_v35  ;;  %981 = vmatprep.mubr.msk.f32.mxu0 %vm1150_vm0, %v1151_v45  ;;  %vm174_vm1 = vcmask 392512   ;;  %vm181_vm2 = vcmask 458112   ;;  %vm118_vm3 = vcmask 130112  }
   0x2   :  { %v1206_v2 = vld [vmem:[%s1914_s0] sm:$0xff]  ;;  %v78_v3 = vadd.f32 %v1201_v1, %v1196_v0  ;;  %v1213_v4 = vld [vmem:[%s1914_s0 + $0x8] sm:$0xff]  ;;  %v1223_v6 = vld [vmem:[%s1914_s0 + $0x58] sm:$0xff]  ;;  %v54_v21 = vmax.f32 %v1196_v0, %v1201_v1  ;;  %984 = vmatprep.subr.mxu1 %v1151_v45  ;;  %986 = vmatprep.mubr.msk.f32.mxu1 %vm1150_vm0, %v1151_v45  ;;  %v108_v53 = vand.u32 127, %v107_v50  ;;  %v1329_v56 = vshrl.u32 %v107_v50, 7 }
   0x3   :  { %v66_v7 = vadd.f32 %v1213_v4, %v1206_v2  ;;  %v1230_v8 = vld [vmem:[%s1914_s0 + $0x10] sm:$0xff]  ;;  %v1235_v9 = vld [vmem:[%s1914_s0 + $0x18] sm:$0xff]  ;;  %v81_v10 = vadd.f32 %v1223_v6, %v1218_v5  ;;  %v1244_v12 = vld [vmem:[%s1914_s0 + $0x60] sm:$0xff]  ;;  %v42_v19 = vmax.f32 %v1206_v2, %v1213_v4  ;;  %v57_v20 = vmax.f32 %v1218_v5, %v1223_v6 }
   0x4   :  { %79 = vadd.xlane.f32.xlu1 %v78_v3  ;;  %v69_v11 = vadd.f32 %v1235_v9, %v1230_v8  ;;  %v1249_v13 = vld [vmem:[%s1914_s0 + $0x68] sm:$0xff]  ;;  %v1254_v14 = vld [vmem:[%s1914_s0 + $0x20] sm:$0xff]  ;;  %v45_v18 = vmax.f32 %v1230_v8, %v1235_v9  ;;  %v1276_v22 = vld [vmem:[%s1914_s0 + $0x70] sm:$0xff]  ;;  %v164_v57 = vadd.s32 4294967264, %v108_v53  ;;  %v169_v58 = vadd.s32 4294967256, %v108_v53 }
   0x5   :  { %67 = vadd.xlane.f32.xlu0 %v66_v7  ;;  %v1259_v15 = vld [vmem:[%s1914_s0 + $0x28] sm:$0xff]  ;;  %v84_v16 = vadd.f32 %v1249_v13, %v1244_v12  ;;  %v1281_v23 = vld [vmem:[%s1914_s0 + $0x78] sm:$0xff]  ;;  %v1286_v24 = vld [vmem:[%s1914_s0 + $0x30] sm:$0xff]  ;;  %v60_v28 = vmax.f32 %v1244_v12, %v1249_v13  ;;  %v176_v59 = vadd.s32 4294967248, %v108_v53  ;;  %v113_v61 = vadd.s32 4294967288, %v108_v53 }
   0x6   :  { %v72_v17 = vadd.f32 %v1259_v15, %v1254_v14  ;;  %v1291_v25 = vld [vmem:[%s1914_s0 + $0x38] sm:$0xff]  ;;  %v87_v26 = vadd.f32 %v1281_v23, %v1276_v22  ;;  %v48_v29 = vmax.f32 %v1254_v14, %v1259_v15  ;;  %v63_v30 = vmax.f32 %v1276_v22, %v1281_v23  ;;  %v213_v32 = vld [vmem:[%s1915_s1] sm:$0xff]  ;;  %v214_v33 = vld [vmem:[%s1915_s1 + $0x8] sm:$0xff] }
   0x7   :  { %v75_v27 = vadd.f32 %v1291_v25, %v1286_v24  ;;  %v51_v31 = vmax.f32 %v1286_v24, %v1291_v25  ;;  %v990_v34 = vpack.c.bf16 %v214_v33, %v213_v32  ;;  %v215_v36 = vld [vmem:[%s1915_s1 + $0x10] sm:$0xff]  ;;  %v216_v37 = vld [vmem:[%s1915_s1 + $0x18] sm:$0xff]  ;;  %v217_v39 = vld [vmem:[%s1915_s1 + $0x20] sm:$0xff]  ;;  %v183_v63 = vadd.s32 4294967240, %v108_v53 }
   0x8   :  { %82 = vadd.xlane.f32.xlu1 %v81_v10  ;;  %v993_v38 = vpack.c.bf16 %v216_v37, %v215_v36  ;;  %v218_v40 = vld [vmem:[%s1915_s1 + $0x28] sm:$0xff]  ;;  %v219_v42 = vld [vmem:[%s1915_s1 + $0x30] sm:$0xff]  ;;  %v220_v43 = vld [vmem:[%s1915_s1 + $0x38] sm:$0xff]  ;;  %v167_v3 = vsub.s32 %v164_v57, %v1329_v56  ;;  %v120_v7 = vadd.s32 4294967280, %v108_v53  ;;  %v172_v10 = vsub.s32 %v169_v58, %v1329_v56 }
   0x9   :  { %70 = vadd.xlane.f32.xlu0 %v69_v11  ;;  %991 = vmatpush3.bf16.msra.mxu0 %v990_v34  ;;  %v996_v41 = vpack.c.bf16 %v218_v40, %v217_v39  ;;  %v999_v44 = vpack.c.bf16 %v220_v43, %v219_v42  ;;  %vm188_vm4 = vcmask 523712   ;;  %vm125_vm5 = vcmask 195712  }
   0xa   :  { %992 = vmatprep.subr.bf16.mxu0 %v1149_v35  ;;  %v123_v34 = vsub.s32 %v120_v7, %v1329_v56  ;;  %vm132_vm6 = vcmask 261312   ;;  %vm153_vm7 = vcmask 1041409   ;;  %vm211_vm8 = vcmask 261120  }
   0xb   :  { %vm228_vm9 = vcmask 523264   ;;  %vm315_vm10 = vcmask 1043456   ;;  %vm311_vm11 = vcmask 31744  }
   0xc   :  { %85 = vadd.xlane.f32.xlu1 %v84_v16  ;;  %v179_v16 = vsub.s32 %v176_v59, %v1329_v56 }
   0xd   :  { %73 = vadd.xlane.f32.xlu0 %v72_v17  ;;  %994 = vmatpush3.bf16.msra.mxu0 %v993_v38  ;;  %v127_v17 = vadd.s32 4294967272, %v108_v53 }
   0xe   :  { %995 = vmatprep.subr.bf16.mxu0 %v1149_v35 }
   0xf   :  { %v130_v36 = vsub.s32 %v127_v17, %v1329_v56 }
  0x10   :  { %46 = vmax.xlane.f32.xlu1 %v45_v18 }
  0x11   :  { %43 = vmax.xlane.f32.xlu0 %v42_v19  ;;  %997 = vmatpush3.bf16.msra.mxu0 %v996_v41 }
  0x12   :  { %998 = vmatprep.subr.bf16.mxu0 %v1149_v35 }
  0x14   :  { %58 = vmax.xlane.f32.xlu1 %v57_v20 }
  0x15   :  { %55 = vmax.xlane.f32.xlu0 %v54_v21  ;;  %1000 = vmatpush3.bf16.msra.mxu0 %v999_v44 }
  0x18   :  { %88 = vadd.xlane.f32.xlu1 %v87_v26 }
  0x19   :  { %76 = vadd.xlane.f32.xlu0 %v75_v27  ;;  %v116_v27 = vsub.s32 %v113_v61, %v1329_v56 }
  0x1c   :  { %61 = vmax.xlane.f32.xlu1 %v60_v28  ;;  %v111_v28 = vsub.s32 %v108_v53, %v1329_v56 }
  0x1d   :  { %49 = vmax.xlane.f32.xlu0 %v48_v29  ;;  %v186_v29 = vsub.s32 %v183_v63, %v1329_v56 }
  0x20   :  { %64 = vmax.xlane.f32.xlu1 %v63_v30 }
  0x21   :  { %52 = vmax.xlane.f32.xlu0 %v51_v31 }
  0x91   :  { %v80_v46 = vpop.xlane.xlu1 %79 }
  0x92   :  { %v68_v47 = vpop.xlane.xlu0 %67  ;;  %v95_v18 = vmul.f32 0.00390625, %v80_v46 }
  0x93   :  { %v91_v31 = vmul.f32 0.00390625, %v68_v47 }
  0x94   :  { %v193_v37 = vrot.slane %v95_v18, %v167_v3 }
  0x95   :  { %v83_v48 = vpop.xlane.xlu1 %82  ;;  %v168_v47 = vrot.slane %v91_v31, %v167_v3  ;;  %v577_v31 = vld [vmem:[%s1918_s5 + $0x18] sm:$0xff] }
  0x96   :  { %v71_v49 = vpop.xlane.xlu0 %70  ;;  %v96_v11 = vmul.f32 0.00390625, %v83_v48 }
  0x97   :  { %v92_v19 = vmul.f32 0.00390625, %v71_v49 }
  0x98   :  { %v197_v35 = vrot.slane %v96_v11, %v172_v10 }
  0x99   :  { %v86_v51 = vpop.xlane.xlu1 %85  ;;  %v173_v38 = vrot.slane %v92_v19, %v172_v10 }
  0x9a   :  { %v74_v52 = vpop.xlane.xlu0 %73  ;;  %v97_v20 = vmul.f32 0.00390625, %v86_v51  ;;  %v198_v51 = vsel %vm174_vm1, %v197_v35, %v193_v37  ;;  %v639_v35 = vld [vmem:[%s1918_s5 + $0x208] sm:$0xff] }
  0x9b   :  { %v93_v21 = vmul.f32 0.00390625, %v74_v52  ;;  %v175_v53 = vsel %vm174_vm1, %v173_v38, %v168_v47 }
  0x9c   :  { %v202_v39 = vrot.slane %v97_v20, %v179_v16  ;;  %v303_v20 = vld [vmem:[%s1916_s3] sm:$0xf] }
  0x9d   :  { %v47_v54 = vpop.xlane.xlu1 %46  ;;  %v180_v40 = vrot.slane %v93_v21, %v179_v16  ;;  %985 = vmatpush3.msk.msra.mxu1 %vm315_vm10, %v303_v20  ;;  %v949_v21 = vld [vmem:[%s1917_s2] ss:$0 sm:$0xff]  ;;  %v651_v20 = vld [vmem:[%s1918_s5 + $0x268] sm:$0xff] }
  0x9e   :  { %v44_v55 = vpop.xlane.xlu0 %43  ;;  %v117_v42 = vrot.slane %v47_v54, %v116_v27  ;;  %v203_v57 = vsel %vm181_vm2, %v202_v39, %v198_v51  ;;  %v638_v39 = vld [vmem:[%s1918_s5 + $0x200] sm:$0xff] }
  0x9f   :  { %v112_v43 = vrot.slane %v44_v55, %v111_v28  ;;  %v182_v54 = vsel %vm181_vm2, %v180_v40, %v175_v53  ;;  %v640_v40 = vld [vmem:[%s1918_s5 + $0x210] sm:$0xff]  ;;  %v583_v53 = vld [vmem:[%s1918_s5 + $0x48] sm:$0xff] }
  0xa1   :  { %v59_v60 = vpop.xlane.xlu1 %58  ;;  %v119_v55 = vsel %vm118_vm3, %v117_v42, %v112_v43  ;;  %v1067_v42 = vpack.c.bf16 %v640_v40, %v638_v39  ;;  %v581_v43 = vld [vmem:[%s1918_s5 + $0x38] sm:$0xff]  ;;  %v656_v40 = vld [vmem:[%s1918_s5 + $0x290] sm:$0xff] }
  0xa2   :  { %v56_v62 = vpop.xlane.xlu0 %55  ;;  %v141_v44 = vrot.slane %v59_v60, %v116_v27 }
  0xa3   :  { %v137_v45 = vrot.slane %v56_v62, %v111_v28 }
  0xa5   :  { %v89_v26 = vpop.xlane.xlu1 %88  ;;  %v142_v59 = vsel %vm118_vm3, %v141_v44, %v137_v45  ;;  %v578_v44 = vld [vmem:[%s1918_s5 + $0x20] sm:$0xff]  ;;  %v580_v45 = vld [vmem:[%s1918_s5 + $0x30] sm:$0xff] }
  0xa6   :  { %v77_v30 = vpop.xlane.xlu0 %76  ;;  %v98_v32 = vmul.f32 0.00390625, %v89_v26  ;;  %v1007_v47 = vpack.c.bf16 %v580_v45, %v578_v44 }
  0xa7   :  { %v94_v33 = vmul.f32 0.00390625, %v77_v30  ;;  %v575_v30 = vld [vmem:[%s1918_s5 + $0x8] sm:$0xff] }
  0xa8   :  { %v207_v48 = vrot.slane %v98_v32, %v186_v29  ;;  %v574_v32 = vld [vmem:[%s1918_s5] sm:$0xff] }
  0xa9   :  { %v62_v41 = vpop.xlane.xlu1 %61  ;;  %v187_v49 = vrot.slane %v94_v33, %v186_v29  ;;  %v1001_v33 = vpack.c.bf16 %v577_v31, %v575_v30  ;;  %v593_v30 = vld [vmem:[%s1918_s5 + $0x98] sm:$0xff] }
  0xaa   :  { %v50_v46 = vpop.xlane.xlu0 %49  ;;  %v146_v50 = vrot.slane %v62_v41, %v123_v34  ;;  %v208_v62 = vsel %vm188_vm4, %v207_v48, %v203_v57  ;;  %v579_v41 = vld [vmem:[%s1918_s5 + $0x28] sm:$0xff]  ;;  %v585_v57 = vld [vmem:[%s1918_s5 + $0x58] sm:$0xff] }
  0xab   :  { %v124_v52 = vrot.slane %v50_v46, %v123_v34  ;;  %v189_v63 = vsel %vm188_vm4, %v187_v49, %v182_v54  ;;  %v576_v34 = vld [vmem:[%s1918_s5 + $0x10] sm:$0xff]  ;;  %1002 = vmatprep.subr.bf16.mxu0 %v1001_v33  ;;  %v1005_v46 = vpack.c.bf16 %v581_v43, %v579_v41  ;;  %v643_v48 = vld [vmem:[%s1918_s5 + $0x228] sm:$0xff]  ;;  %v645_v49 = vld [vmem:[%s1918_s5 + $0x238] sm:$0xff]  ;;  %v1009_v54 = vpack.c.bf16 %v585_v57, %v583_v53 }
  0xac   :  { %v147_v3 = vsel %vm125_vm5, %v146_v50, %v142_v59  ;;  %v209_v18 = vsel %vm153_vm7, %v208_v62, %v189_v63  ;;  %v1003_v37 = vpack.c.bf16 %v576_v34, %v574_v32  ;;  %v642_v50 = vld [vmem:[%s1918_s5 + $0x220] sm:$0xff]  ;;  %v1069_v51 = vpack.c.bf16 %v645_v49, %v643_v48  ;;  %v584_v59 = vld [vmem:[%s1918_s5 + $0x50] sm:$0xff]  ;;  %v655_v32 = vld [vmem:[%s1918_s5 + $0x288] sm:$0xff] }
  0xad   :  { %v65_v58 = vpop.xlane.xlu1 %64  ;;  %v126_v10 = vsel %vm125_vm5, %v124_v52, %v119_v55  ;;  %v644_v52 = vld [vmem:[%s1918_s5 + $0x230] sm:$0xff]  ;;  %v582_v55 = vld [vmem:[%s1918_s5 + $0x40] sm:$0xff]  ;;  %v657_v33 = vld [vmem:[%s1918_s5 + $0x298] sm:$0xff] }
  0xae   :  { %v151_v60 = vrot.slane %v65_v58, %v130_v36  ;;  %v53_v61 = vpop.xlane.xlu0 %52  ;;  %v1071_v58 = vpack.c.bf16 %v644_v52, %v642_v50  ;;  %v646_v62 = vld [vmem:[%s1918_s5 + $0x240] sm:$0xff]  ;;  %v648_v63 = vld [vmem:[%s1918_s5 + $0x250] sm:$0xff]  ;;  %v1081_v39 = vpack.c.bf16 %v657_v33, %v655_v32  ;;  %v595_v41 = vld [vmem:[%s1918_s5 + $0xa8] sm:$0xff] }
  0xaf   :  { %v131_v7 = vrot.slane %v53_v61, %v130_v36  ;;  %v641_v36 = vld [vmem:[%s1918_s5 + $0x218] sm:$0xff]  ;;  %v951_v49 = vld [vmem:[%s1919_s4] ss:$0 sm:$0xff]  ;;  %v667_v33 = vld [vmem:[%s1918_s5 + $0x2e8] sm:$0xff] }
  0xb0   :  { %v152_v11 = vsel %vm132_vm6, %v151_v60, %v147_v3  ;;  %v1065_v38 = vpack.c.bf16 %v641_v36, %v639_v35  ;;  %v647_v60 = vld [vmem:[%s1918_s5 + $0x248] sm:$0xff]  ;;  %v649_v61 = vld [vmem:[%s1918_s5 + $0x258] sm:$0xff]  ;;  %v1011_v3 = vpack.c.bf16 %v584_v59, %v582_v55  ;;  %v590_v36 = vld [vmem:[%s1918_s5 + $0x80] sm:$0xff] }
  0xb1   :  { %v133_v16 = vsel %vm132_vm6, %v131_v7, %v126_v10  ;;  %v1073_v7 = vpack.c.bf16 %v649_v61, %v647_v60  ;;  %v587_v10 = vld [vmem:[%s1918_s5 + $0x68] sm:$0xff]  ;;  %v658_v59 = vld [vmem:[%s1918_s5 + $0x2a0] sm:$0xff]  ;;  %v660_v60 = vld [vmem:[%s1918_s5 + $0x2b0] sm:$0xff] }
  0xb2   :  { %v154_v17 = vsel %vm153_vm7, %v152_v11, %v133_v16  ;;  %1066 = vmatprep.subr.bf16.mxu1 %v1065_v38  ;;  %v589_v11 = vld [vmem:[%s1918_s5 + $0x78] sm:$0xff]  ;;  %v586_v16 = vld [vmem:[%s1918_s5 + $0x60] sm:$0xff]  ;;  %v1087_v61 = vpack.c.bf16 %v660_v60, %v658_v59  ;;  %v675_v59 = vld [vmem:[%s1918_s5 + $0x328] sm:$0xff] }
  0xb3   :  { %v212_v19 = vsel %vm211_vm8, %v154_v17, %v209_v18  ;;  %v1075_v17 = vpack.c.bf16 %v648_v63, %v646_v62  ;;  %v1013_v18 = vpack.c.bf16 %v589_v11, %v587_v10  ;;  %v654_v38 = vld [vmem:[%s1918_s5 + $0x280] sm:$0xff]  ;;  %v599_v62 = vld [vmem:[%s1918_s5 + $0xc8] sm:$0xff]  ;;  %v601_v63 = vld [vmem:[%s1918_s5 + $0xd8] sm:$0xff] }
  0xb4   :  { %982 = vmatmul.mubr.msk.f32.vlgmr.msra.gmra.mrb[0].mxu0 %vm228_vm9, %v212_v19  ;;  %v588_v19 = vld [vmem:[%s1918_s5 + $0x70] sm:$0xff]  ;;  %v1083_v44 = vpack.c.bf16 %v656_v40, %v654_v38  ;;  %v607_v40 = vld [vmem:[%s1918_s5 + $0x108] sm:$0xff]  ;;  %v677_v60 = vld [vmem:[%s1918_s5 + $0x338] sm:$0xff] }
  0xb5   :  { %1004 = vmatpush1.bf16.msra.mxu0 %v1003_v37  ;;  %v1015_v31 = vpack.c.bf16 %v588_v19, %v586_v16  ;;  %v592_v37 = vld [vmem:[%s1918_s5 + $0x90] sm:$0xff]  ;;  %v663_v16 = vld [vmem:[%s1918_s5 + $0x2c8] sm:$0xff]  ;;  %v662_v19 = vld [vmem:[%s1918_s5 + $0x2c0] sm:$0xff] }
  0xb6   :  { %1006 = vmatprep.subr.bf16.mxu0 %v1005_v46  ;;  %v1019_v43 = vpack.c.bf16 %v592_v37, %v590_v36  ;;  %v594_v46 = vld [vmem:[%s1918_s5 + $0xa0] sm:$0xff]  ;;  %v600_v10 = vld [vmem:[%s1918_s5 + $0xd0] sm:$0xff] }
  0xb7   :  { %v666_v37 = vld [vmem:[%s1918_s5 + $0x2e0] sm:$0xff]  ;;  %v668_v38 = vld [vmem:[%s1918_s5 + $0x2f0] sm:$0xff] }
  0xb9   :  { %1008 = vmatpush1.bf16.msra.mxu0 %v1007_v47  ;;  %v596_v47 = vld [vmem:[%s1918_s5 + $0xb0] sm:$0xff] }
  0xba   :  { %1010 = vmatprep.subr.bf16.mxu0 %v1009_v54  ;;  %v1023_v48 = vpack.c.bf16 %v596_v47, %v594_v46  ;;  %v661_v54 = vld [vmem:[%s1918_s5 + $0x2b8] sm:$0xff]  ;;  %v671_v46 = vld [vmem:[%s1918_s5 + $0x308] sm:$0xff] }
  0xbb   :  { %v673_v47 = vld [vmem:[%s1918_s5 + $0x318] sm:$0xff] }
  0xbd   :  { %1012 = vmatpush1.bf16.msra.mxu0 %v1011_v3  ;;  %v1025_v3 = vpack.c.bf16 %v601_v63, %v599_v62  ;;  %v674_v62 = vld [vmem:[%s1918_s5 + $0x320] sm:$0xff]  ;;  %v676_v63 = vld [vmem:[%s1918_s5 + $0x330] sm:$0xff] }
  0xbe   :  { %1014 = vmatprep.subr.bf16.mxu0 %v1013_v18 }
  0xc1   :  { %1016 = vmatpush1.bf16.msra.mxu0 %v1015_v31 }
 0x187   :  { %v298_v26 = vpop.f32.mrb[0].mxu0 }
 0x188   :  { %v299_v27 = vadd.f32 %v949_v21, %v298_v26  ;;  %v983_v28 = vpop.f32.mrb[1].mxu0  ;;  %v653_v21 = vld [vmem:[%s1918_s5 + $0x278] sm:$0xff] }
 0x189   :  { %v1077_v26 = vpack.c.bf16 %v653_v21, %v651_v20  ;;  %v652_v28 = vld [vmem:[%s1918_s5 + $0x270] sm:$0xff] }
 0x18a   :  { %v302_v29 = vmax.f32 %v299_v27, 0.0  ;;  %v650_v27 = vld [vmem:[%s1918_s5 + $0x260] sm:$0xff]  ;;  %v664_v20 = vld [vmem:[%s1918_s5 + $0x2d0] sm:$0xff] }
 0x18b   :  { %v1079_v34 = vpack.c.bf16 %v652_v28, %v650_v27  ;;  %v1091_v21 = vpack.c.bf16 %v664_v20, %v662_v19  ;;  %v605_v27 = vld [vmem:[%s1918_s5 + $0xf8] sm:$0xff]  ;;  %v679_v20 = vld [vmem:[%s1918_s5 + $0x348] sm:$0xff] }
 0x18c   :  { %987 = vmatmul.mubr.msk.f32.vlgmr.msra.gmra.mrb[0].mxu1 %vm311_vm11, %v302_v29  ;;  %v591_v29 = vld [vmem:[%s1918_s5 + $0x88] sm:$0xff] }
 0x18d   :  { %1068 = vmatpush1.bf16.msra.mxu1 %v1067_v42  ;;  %v1017_v35 = vpack.c.bf16 %v593_v30, %v591_v29  ;;  %v597_v42 = vld [vmem:[%s1918_s5 + $0xb8] sm:$0xff]  ;;  %v602_v29 = vld [vmem:[%s1918_s5 + $0xe0] sm:$0xff]  ;;  %v604_v30 = vld [vmem:[%s1918_s5 + $0xf0] sm:$0xff] }
 0x18e   :  { %1070 = vmatprep.subr.bf16.mxu1 %v1069_v51  ;;  %v1021_v45 = vpack.c.bf16 %v597_v42, %v595_v41  ;;  %v1031_v32 = vpack.c.bf16 %v604_v30, %v602_v29  ;;  %v609_v41 = vld [vmem:[%s1918_s5 + $0x118] sm:$0xff]  ;;  %v680_v29 = vld [vmem:[%s1918_s5 + $0x350] sm:$0xff] }
 0x18f   :  { %1018 = vmatprep.subr.bf16.mxu0 %v1017_v35  ;;  %v1033_v42 = vpack.c.bf16 %v609_v41, %v607_v40  ;;  %v685_v40 = vld [vmem:[%s1918_s5 + $0x378] sm:$0xff] }
 0x190   :  { %1020 = vmatpush1.bf16.msra.mxu0 %v1019_v43  ;;  %v606_v43 = vld [vmem:[%s1918_s5 + $0x100] sm:$0xff] }
 0x191   :  { %1072 = vmatpush1.bf16.msra.mxu1 %v1071_v58  ;;  %1022 = vmatprep.subr.bf16.mxu0 %v1021_v45  ;;  %v659_v58 = vld [vmem:[%s1918_s5 + $0x2a8] sm:$0xff] }
 0x192   :  { %1074 = vmatprep.subr.bf16.mxu1 %v1073_v7  ;;  %v1085_v55 = vpack.c.bf16 %v661_v54, %v659_v58  ;;  %v598_v7 = vld [vmem:[%s1918_s5 + $0xc0] sm:$0xff]  ;;  %v612_v54 = vld [vmem:[%s1918_s5 + $0x130] sm:$0xff] }
 0x193   :  { %v1027_v11 = vpack.c.bf16 %v600_v10, %v598_v7  ;;  %v610_v58 = vld [vmem:[%s1918_s5 + $0x120] sm:$0xff]  ;;  %v1103_v7 = vpack.c.bf16 %v676_v63, %v674_v62  ;;  %v615_v10 = vld [vmem:[%s1918_s5 + $0x148] sm:$0xff]  ;;  %v628_v63 = vld [vmem:[%s1918_s5 + $0x1b0] sm:$0xff] }
 0x194   :  { %1024 = vmatpush1.bf16.msra.mxu0 %v1023_v48  ;;  %v1097_v48 = vpack.c.bf16 %v673_v47, %v671_v46  ;;  %v623_v46 = vld [vmem:[%s1918_s5 + $0x188] sm:$0xff]  ;;  %v625_v47 = vld [vmem:[%s1918_s5 + $0x198] sm:$0xff] }
 0x195   :  { %1076 = vmatpush1.bf16.msra.mxu1 %v1075_v17  ;;  %v665_v17 = vld [vmem:[%s1918_s5 + $0x2d8] sm:$0xff]  ;;  %1026 = vmatprep.subr.bf16.mxu0 %v1025_v3  ;;  %v1599_v3 = vsub.s32 0, %v1329_v56 }
 0x196   :  { %1078 = vmatprep.subr.bf16.mxu1 %v1077_v26  ;;  %v1089_v18 = vpack.c.bf16 %v665_v17, %v663_v16  ;;  %v603_v26 = vld [vmem:[%s1918_s5 + $0xe8] sm:$0xff]  ;;  %v614_v17 = vld [vmem:[%s1918_s5 + $0x140] sm:$0xff] }
 0x197   :  { %v1029_v28 = vpack.c.bf16 %v605_v27, %v603_v26 }
 0x198   :  { %1028 = vmatpush1.bf16.msra.mxu0 %v1027_v11  ;;  %v617_v11 = vld [vmem:[%s1918_s5 + $0x158] sm:$0xff] }
 0x199   :  { %1080 = vmatpush1.bf16.msra.mxu1 %v1079_v34  ;;  %v669_v34 = vld [vmem:[%s1918_s5 + $0x2f8] sm:$0xff]  ;;  %1030 = vmatprep.subr.bf16.mxu0 %v1029_v28  ;;  %v1041_v16 = vpack.c.bf16 %v617_v11, %v615_v10  ;;  %v678_v28 = vld [vmem:[%s1918_s5 + $0x340] sm:$0xff] }
 0x19a   :  { %1082 = vmatprep.subr.bf16.mxu1 %v1081_v39  ;;  %v1093_v36 = vpack.c.bf16 %v669_v34, %v667_v33  ;;  %v1095_v39 = vpack.c.bf16 %v668_v38, %v666_v37  ;;  %v619_v33 = vld [vmem:[%s1918_s5 + $0x168] sm:$0xff]  ;;  %v621_v34 = vld [vmem:[%s1918_s5 + $0x178] sm:$0xff]  ;;  %v620_v37 = vld [vmem:[%s1918_s5 + $0x170] sm:$0xff] }
 0x19b   :  { %v693_v10 = vld [vmem:[%s1918_s5 + $0x3b8] sm:$0xff] }
 0x19c   :  { %1032 = vmatpush1.bf16.msra.mxu0 %v1031_v32  ;;  %v1107_v32 = vpack.c.bf16 %v680_v29, %v678_v28  ;;  %v695_v29 = vld [vmem:[%s1918_s5 + $0x3c8] sm:$0xff] }
 0x19d   :  { %1084 = vmatpush1.bf16.msra.mxu1 %v1083_v44  ;;  %v608_v44 = vld [vmem:[%s1918_s5 + $0x110] sm:$0xff]  ;;  %1034 = vmatprep.subr.bf16.mxu0 %v1033_v42  ;;  %v682_v42 = vld [vmem:[%s1918_s5 + $0x360] sm:$0xff] }
 0x19e   :  { %1086 = vmatprep.subr.bf16.mxu1 %v1085_v55  ;;  %v1035_v45 = vpack.c.bf16 %v608_v44, %v606_v43  ;;  %v1039_v55 = vpack.c.bf16 %v612_v54, %v610_v58  ;;  %v684_v43 = vld [vmem:[%s1918_s5 + $0x370] sm:$0xff] }
 0x19f   :  { %v688_v58 = vld [vmem:[%s1918_s5 + $0x390] sm:$0xff] }
 0x1a0   :  { %1036 = vmatpush1.bf16.msra.mxu0 %v1035_v45  ;;  %v1111_v45 = vpack.c.bf16 %v684_v43, %v682_v42  ;;  %v701_v42 = vld [vmem:[%s1918_s5 + $0x3f8] sm:$0xff] }
 0x1a1   :  { %1088 = vmatpush1.bf16.msra.mxu1 %v1087_v61  ;;  %v1101_v61 = vpack.c.bf16 %v677_v60, %v675_v59  ;;  %v627_v59 = vld [vmem:[%s1918_s5 + $0x1a8] sm:$0xff]  ;;  %v629_v60 = vld [vmem:[%s1918_s5 + $0x1b8] sm:$0xff] }
 0x1a2   :  { %1090 = vmatprep.subr.bf16.mxu1 %v1089_v18  ;;  %v616_v18 = vld [vmem:[%s1918_s5 + $0x150] sm:$0xff]  ;;  %v1053_v62 = vpack.c.bf16 %v629_v60, %v627_v59 }
 0x1a3   :  { %v1043_v19 = vpack.c.bf16 %v616_v18, %v614_v17  ;;  %v690_v17 = vld [vmem:[%s1918_s5 + $0x3a0] sm:$0xff]  ;;  %v692_v18 = vld [vmem:[%s1918_s5 + $0x3b0] sm:$0xff] }
 0x1a5   :  { %1092 = vmatpush1.bf16.msra.mxu1 %v1091_v21  ;;  %v681_v21 = vld [vmem:[%s1918_s5 + $0x358] sm:$0xff] }
 0x1a6   :  { %1094 = vmatprep.subr.bf16.mxu1 %v1093_v36  ;;  %v1105_v27 = vpack.c.bf16 %v681_v21, %v679_v20  ;;  %v618_v36 = vld [vmem:[%s1918_s5 + $0x160] sm:$0xff]  ;;  %v633_v20 = vld [vmem:[%s1918_s5 + $0x1d8] sm:$0xff] }
 0x1a7   :  { %v1047_v38 = vpack.c.bf16 %v620_v37, %v618_v36  ;;  %v630_v21 = vld [vmem:[%s1918_s5 + $0x1c0] sm:$0xff]  ;;  %v635_v36 = vld [vmem:[%s1918_s5 + $0x1e8] sm:$0xff]  ;;  %v637_v37 = vld [vmem:[%s1918_s5 + $0x1f8] sm:$0xff] }
 0x1a9   :  { %1096 = vmatpush1.bf16.msra.mxu1 %v1095_v39  ;;  %v683_v39 = vld [vmem:[%s1918_s5 + $0x368] sm:$0xff] }
 0x1aa   :  { %1098 = vmatprep.subr.bf16.mxu1 %v1097_v48  ;;  %v1109_v41 = vpack.c.bf16 %v685_v40, %v683_v39  ;;  %v1049_v48 = vpack.c.bf16 %v625_v47, %v623_v46  ;;  %v634_v39 = vld [vmem:[%s1918_s5 + $0x1e0] sm:$0xff]  ;;  %v636_v40 = vld [vmem:[%s1918_s5 + $0x1f0] sm:$0xff] }
 0x1ab   :  { %v698_v47 = vld [vmem:[%s1918_s5 + $0x3e0] sm:$0xff] }
 0x25f   :  { %v385_v50 = vpop.f32.mrb[0].mxu1 }
 0x260   :  { %v386_v51 = vadd.f32 %v951_v49, %v385_v50  ;;  %v988_v52 = vpop.f32.mrb[1].mxu1  ;;  %v670_v49 = vld [vmem:[%s1918_s5 + $0x300] sm:$0xff]  ;;  %v672_v50 = vld [vmem:[%s1918_s5 + $0x310] sm:$0xff] }
 0x261   :  { %v611_v52 = vld [vmem:[%s1918_s5 + $0x128] sm:$0xff] }
 0x262   :  { %v389_v53 = vsub.f32 0.0, %v386_v51  ;;  %v1099_v51 = vpack.c.bf16 %v672_v50, %v670_v49  ;;  %v622_v49 = vld [vmem:[%s1918_s5 + $0x180] sm:$0xff]  ;;  %v624_v50 = vld [vmem:[%s1918_s5 + $0x190] sm:$0xff] }
 0x264   :  { %v390_v57 = vmul.f32 1.442695, %v389_v53  ;;  %v613_v53 = vld [vmem:[%s1918_s5 + $0x138] sm:$0xff]  ;;  %1100 = vmatpush1.bf16.msra.mxu1 %v1099_v51  ;;  %v687_v51 = vld [vmem:[%s1918_s5 + $0x388] sm:$0xff] }
 0x265   :  { %1102 = vmatprep.subr.bf16.mxu1 %v1101_v61  ;;  %v626_v61 = vld [vmem:[%s1918_s5 + $0x1a0] sm:$0xff] }
 0x266   :  { %1137 = vpow2.f32 %v390_v57  ;;  %v1037_v57 = vpack.c.bf16 %v613_v53, %v611_v52  ;;  %v1051_v52 = vpack.c.bf16 %v624_v50, %v622_v49  ;;  %v689_v53 = vld [vmem:[%s1918_s5 + $0x398] sm:$0xff]  ;;  %v1055_v11 = vpack.c.bf16 %v628_v63, %v626_v61 }
 0x267   :  { %v1113_v54 = vpack.c.bf16 %v689_v53, %v687_v51 }
 0x268   :  { %1038 = vmatprep.subr.bf16.mxu0 %v1037_v57  ;;  %1104 = vmatpush1.bf16.msra.mxu1 %v1103_v7  ;;  %v686_v57 = vld [vmem:[%s1918_s5 + $0x380] sm:$0xff]  ;;  %v691_v7 = vld [vmem:[%s1918_s5 + $0x3a8] sm:$0xff] }
 0x269   :  { %1040 = vmatpush1.bf16.msra.mxu0 %v1039_v55  ;;  %1106 = vmatprep.subr.bf16.mxu1 %v1105_v27  ;;  %v1115_v55 = vpack.c.bf16 %v688_v58, %v686_v57  ;;  %v1119_v27 = vpack.c.bf16 %v692_v18, %v690_v17 }
 0x26a   :  { %1042 = vmatprep.subr.bf16.mxu0 %v1041_v16  ;;  %v1117_v16 = vpack.c.bf16 %v693_v10, %v691_v7 }
 0x26c   :  { %1108 = vmatpush1.bf16.msra.mxu1 %v1107_v32  ;;  %v694_v32 = vld [vmem:[%s1918_s5 + $0x3c0] sm:$0xff] }
 0x26d   :  { %1044 = vmatpush1.bf16.msra.mxu0 %v1043_v19  ;;  %1110 = vmatprep.subr.bf16.mxu1 %v1109_v41  ;;  %v631_v19 = vld [vmem:[%s1918_s5 + $0x1c8] sm:$0xff] }
 0x26e   :  { %v1057_v28 = vpack.c.bf16 %v633_v20, %v631_v19  ;;  %v699_v41 = vld [vmem:[%s1918_s5 + $0x3e8] sm:$0xff] }
 0x26f   :  { %v1125_v46 = vpack.c.bf16 %v701_v42, %v699_v41 }
 0x270   :  { %v1138_v31 = vpop.eup %1137  ;;  %1112 = vmatpush1.bf16.msra.mxu1 %v1111_v45  ;;  %v1063_v45 = vpack.c.bf16 %v636_v40, %v634_v39 }
 0x271   :  { %v392_v35 = vadd.f32 1.0, %v1138_v31  ;;  %v1627_v31 = vsub.s32 1, %v1329_v56  ;;  %1114 = vmatprep.subr.bf16.mxu1 %v1113_v54 }
 0x273   :  { %1139 = vrcp.f32 %v392_v35  ;;  %v1045_v35 = vpack.c.bf16 %v621_v34, %v619_v33 }
 0x274   :  { %1116 = vmatpush1.bf16.msra.mxu1 %v1115_v55 }
 0x275   :  { %1046 = vmatprep.subr.bf16.mxu0 %v1045_v35  ;;  %1118 = vmatprep.subr.bf16.mxu1 %v1117_v16  ;;  %v696_v35 = vld [vmem:[%s1918_s5 + $0x3d0] sm:$0xff] }
 0x276   :  { %1048 = vmatpush1.bf16.msra.mxu0 %v1047_v38  ;;  %v1061_v38 = vpack.c.bf16 %v637_v37, %v635_v36  ;;  %v1123_v43 = vpack.c.bf16 %v696_v35, %v694_v32 }
 0x277   :  { %1050 = vmatprep.subr.bf16.mxu0 %v1049_v48  ;;  %v700_v48 = vld [vmem:[%s1918_s5 + $0x3f0] sm:$0xff] }
 0x278   :  { %1120 = vmatpush1.bf16.msra.mxu1 %v1119_v27  ;;  %v1127_v49 = vpack.c.bf16 %v700_v48, %v698_v47 }
 0x27a   :  { %1052 = vmatpush1.bf16.msra.mxu0 %v1051_v52 }
 0x27b   :  { %1054 = vmatprep.subr.bf16.mxu0 %v1053_v62 }
 0x27d   :  { %v1140_v26 = vpop.eup %1139 }
 0x27e   :  { %v398_v30 = vrot.slane %v1140_v26, %v1599_v3  ;;  %v1654_v44 = vrot.slane %v1140_v26, %v1627_v31  ;;  %v632_v26 = vld [vmem:[%s1918_s5 + $0x1d0] sm:$0xff]  ;;  %1056 = vmatpush1.bf16.msra.mxu0 %v1055_v11 }
 0x27f   :  { %v1059_v33 = vpack.c.bf16 %v632_v26, %v630_v21  ;;  %1058 = vmatprep.subr.bf16.mxu0 %v1057_v28 }
 0x280   :  { %404 = vbcast.lane.b32.xlu1 %v398_v30, 264  ;;  %400 = vbcast.lane.b32.xlu0 %v398_v30, 256 }
 0x282   :  { %1060 = vmatpush1.bf16.msra.mxu0 %v1059_v33 }
 0x283   :  { %1062 = vmatprep.subr.bf16.mxu0 %v1061_v38 }
 0x284   :  { %419 = vbcast.lane.b32.xlu1 %v1654_v44, 256  ;;  %408 = vbcast.lane.b32.xlu0 %v398_v30, 272 }
 0x286   :  { %1064 = vmatpush1.bf16.msra.mxu0 %v1063_v45 }
 0x288   :  { %423 = vbcast.lane.b32.xlu1 %v1654_v44, 264  ;;  %412 = vbcast.lane.b32.xlu0 %v398_v30, 280  ;;  %v697_v30 = vld [vmem:[%s1918_s5 + $0x3d8] sm:$0xff] }
 0x289   :  { %v1121_v34 = vpack.c.bf16 %v697_v30, %v695_v29 }
 0x28b   :  { %1122 = vmatprep.subr.bf16.mxu1 %v1121_v34 }
 0x28c   :  { %427 = vbcast.lane.b32.xlu1 %v1654_v44, 272  ;;  %1124 = vmatpush1.bf16.msra.mxu1 %v1123_v43 }
 0x28d   :  { %1126 = vmatprep.subr.bf16.mxu1 %v1125_v46 }
 0x290   :  { %431 = vbcast.lane.b32.xlu1 %v1654_v44, 280  ;;  %1128 = vmatpush1.bf16.msra.mxu1 %v1127_v49 }
 0x2f2   :  { %v405_v50 = vpop.permute.xlu1 %404  ;;  %v401_v51 = vpop.permute.xlu0 %400 }
 0x2f3   :  { %v1757_v52 = vmul.f32 %v405_v50, %v1230_v8  ;;  %v1760_v44 = vmul.f32 %v405_v50, %v1235_v9  ;;  %v1763_v53 = vmul.f32 %v401_v51, %v1206_v2  ;;  %v1766_v57 = vmul.f32 %v401_v51, %v1213_v4 }
 0x2f5   :  { %v490_v8 = vmax.f32 %v1766_v57, %v1760_v44  ;;  %v481_v9 = vmax.f32 %v1763_v53, %v1757_v52  ;;  %v526_v4 = vadd.f32 %v1760_v44, %v1766_v57  ;;  %v517_v61 = vadd.f32 %v1757_v52, %v1763_v53 }
 0x2f6   :  { %v420_v58 = vpop.permute.xlu1 %419  ;;  %v409_v54 = vpop.permute.xlu0 %408 }
 0x2f7   :  { %v1769_v55 = vmul.f32 %v409_v54, %v1254_v14  ;;  %v1772_v59 = vmul.f32 %v409_v54, %v1259_v15  ;;  %v1804_v18 = vmul.f32 %v420_v58, %v1201_v1 }
 0x2f9   :  { %v491_v62 = vmax.f32 %v490_v8, %v1772_v59  ;;  %v482_v63 = vmax.f32 %v481_v9, %v1769_v55  ;;  %v527_v7 = vadd.f32 %v526_v4, %v1772_v59  ;;  %v518_v10 = vadd.f32 %v517_v61, %v1769_v55 }
 0x2fa   :  { %v424_v60 = vpop.permute.xlu1 %423  ;;  %v413_v2 = vpop.permute.xlu0 %412 }
 0x2fb   :  { %v1783_v14 = vmul.f32 %v413_v2, %v1286_v24  ;;  %v1786_v15 = vmul.f32 %v413_v2, %v1291_v25  ;;  %v1793_v11 = vmul.f32 %v424_v60, %v1218_v5  ;;  %v1796_v16 = vmul.f32 %v424_v60, %v1223_v6 }
 0x2fc   :  { %v1801_v25 = vmul.f32 %v420_v58, %v1196_v0 }
 0x2fd   :  { %v492_v24 = vmax.f32 %v491_v62, %v1786_v15  ;;  %v483_v17 = vmax.f32 %v482_v63, %v1783_v14  ;;  %v528_v20 = vadd.f32 %v527_v7, %v1786_v15  ;;  %v519_v21 = vadd.f32 %v518_v10, %v1783_v14 }
 0x2fe   :  { %v428_v19 = vpop.permute.xlu1 %427  ;;  %v508_v1 = vmax.f32 %v1804_v18, %v1796_v16  ;;  %v499_v32 = vmax.f32 %v1801_v25, %v1793_v11 }
 0x2ff   :  { %v1809_v5 = vmul.f32 %v428_v19, %v1244_v12  ;;  %v1812_v6 = vmul.f32 %v428_v19, %v1249_v13  ;;  %v493_v26 = vrot.slane %v492_v24, 4  ;;  %v484_v27 = vrot.slane %v483_v17, 4 }
 0x300   :  { %v529_v28 = vrot.slane %v528_v20, 4  ;;  %v520_v29 = vrot.slane %v519_v21, 4  ;;  %v544_v12 = vadd.f32 %v1796_v16, %v1804_v18  ;;  %v535_v13 = vadd.f32 %v1793_v11, %v1801_v25 }
 0x301   :  { %v494_v0 = vmax.f32 %v492_v24, %v493_v26  ;;  %v485_v30 = vmax.f32 %v483_v17, %v484_v27  ;;  %v509_v38 = vmax.f32 %v508_v1, %v1812_v6  ;;  %v500_v39 = vmax.f32 %v499_v32, %v1809_v5 }
 0x302   :  { %v432_v33 = vpop.permute.xlu1 %431  ;;  %v530_v34 = vadd.f32 %v529_v28, %v528_v20  ;;  %v521_v35 = vadd.f32 %v520_v29, %v519_v21  ;;  %v545_v41 = vadd.f32 %v544_v12, %v1812_v6  ;;  %v536_v43 = vadd.f32 %v535_v13, %v1809_v5 }
 0x303   :  { %v1823_v36 = vmul.f32 %v432_v33, %v1276_v22  ;;  %v1826_v37 = vmul.f32 %v432_v33, %v1281_v23  ;;  %v495_v45 = vrot.slane %v494_v0, 2  ;;  %v486_v47 = vrot.slane %v485_v30, 2 }
 0x304   :  { %v531_v40 = vrot.slane %v530_v34, 2  ;;  %v522_v42 = vrot.slane %v521_v35, 2 }
 0x305   :  { %v510_v46 = vmax.f32 %v509_v38, %v1826_v37  ;;  %v501_v22 = vmax.f32 %v500_v39, %v1823_v36  ;;  %v546_v48 = vadd.f32 %v545_v41, %v1826_v37  ;;  %v537_v23 = vadd.f32 %v536_v43, %v1823_v36 }
 0x306   :  { %v532_v51 = vadd.f32 %v531_v40, %v530_v34  ;;  %v523_v54 = vadd.f32 %v522_v42, %v521_v35  ;;  %v496_v9 = vmax.f32 %v494_v0, %v495_v45  ;;  %v487_v2 = vmax.f32 %v485_v30, %v486_v47 }
 0x307   :  { %v511_v49 = vrot.slane %v510_v46, 4  ;;  %v502_v50 = vrot.slane %v501_v22, 4  ;;  %v547_v58 = vrot.slane %v546_v48, 4  ;;  %v538_v8 = vrot.slane %v537_v23, 4 }
 0x308   :  { %v533_v10 = vrot.slane %v532_v51, 1  ;;  %v524_v17 = vrot.slane %v523_v54, 1  ;;  %v497_v20 = vrot.slane %v496_v9, 1  ;;  %v488_v26 = vrot.slane %v487_v2, 1 }
 0x309   :  { %v512_v60 = vmax.f32 %v510_v46, %v511_v49  ;;  %v503_v4 = vmax.f32 %v501_v22, %v502_v50  ;;  %v548_v61 = vadd.f32 %v547_v58, %v546_v48  ;;  %v539_v62 = vadd.f32 %v538_v8, %v537_v23  ;;  %v702_v23 = vld [vmem:[%s1920_s6] sm:$0x3] }
 0x30a   :  { %v534_v0 = vadd.f32 %v533_v10, %v532_v51  ;;  %v525_v30 = vadd.f32 %v524_v17, %v523_v54  ;;  %v498_v12 = vmax.f32 %v496_v9, %v497_v20  ;;  %v489_v13 = vmax.f32 %v487_v2, %v488_v26 }
 0x30b   :  { %v513_v63 = vrot.slane %v512_v60, 2  ;;  %v504_v7 = vrot.slane %v503_v4, 2  ;;  %v549_v24 = vrot.slane %v548_v61, 2  ;;  %v540_v19 = vrot.slane %v539_v62, 2 }
 0x30c   :  { %v555_v43 = vmul.f32 0.03125, %v534_v0  ;;  %v554_v46 = vmul.f32 0.03125, %v525_v30  ;;  %v707_v49 = vrot.slane %v702_v23, %v1599_v3  ;;  %v711_v50 = vrot.slane %v702_v23, %v1627_v31 }
 0x30d   :  { %v514_v21 = vmax.f32 %v512_v60, %v513_v63  ;;  %v505_v27 = vmax.f32 %v503_v4, %v504_v7  ;;  %v550_v28 = vadd.f32 %v549_v24, %v548_v61  ;;  %v541_v29 = vadd.f32 %v540_v19, %v539_v62 }
 0x30e   :  { %v1152_v20 = vmov 1966171168  }
 0x30f   :  { %v515_v1 = vrot.slane %v514_v21, 1  ;;  %v506_v32 = vrot.slane %v505_v27, 1  ;;  %v551_v33 = vrot.slane %v550_v28, 1  ;;  %v542_v34 = vrot.slane %v541_v29, 1 }
 0x311   :  { %v516_v35 = vmax.f32 %v514_v21, %v515_v1  ;;  %v507_v38 = vmax.f32 %v505_v27, %v506_v32  ;;  %v552_v39 = vadd.f32 %v551_v33, %v550_v28  ;;  %v543_v40 = vadd.f32 %v542_v34, %v541_v29 }
 0x312   :  { %v872_v21 = vunpack.c.l.s4 %v1152_v20 }
 0x313   :  { %v563_v41 = vsel %vm153_vm7, %v516_v35, %v498_v12  ;;  %v562_v42 = vsel %vm153_vm7, %v507_v38, %v489_v13  ;;  %v557_v45 = vmul.f32 0.03125, %v552_v39  ;;  %v556_v47 = vmul.f32 0.03125, %v543_v40 }
 0x314   :  { %778 = vmatprep.mubr.f32.mxu0 %v563_v41  ;;  %v873_v26 = vunpack.c.0.s8 %v872_v21 }
 0x315   :  { %779 = vmatmul.mubr.f32.vlgmr.msra.gmra.mrb[2].mxu0 %v562_v42  ;;  %v571_v22 = vsel %vm153_vm7, %v557_v45, %v555_v43  ;;  %v570_v48 = vsel %vm153_vm7, %v556_v47, %v554_v46 }
 0x316   :  { %849 = vmatprep.mubr.f32.mxu1 %v571_v22  ;;  %v876_v28 = vsub.s32 %v873_v26, %v1329_v56 }
 0x317   :  { %850 = vmatmul.mubr.f32.vlgmr.msra.gmra.mrb[2].mxu1 %v570_v48 }
 0x3e8   :  { %v780_v51 = vpop.f32.mrb[2].mxu0 }
 0x3e9   :  { %v781_v58 = vadd.f32 %v780_v51, %v707_v49  ;;  %v782_v54 = vpop.f32.mrb[3].mxu0 }
 0x3ea   :  { %v783_v8 = vadd.f32 %v782_v54, %v711_v50  ;;  %v851_v9 = vpop.f32.mrb[2].mxu1 }
 0x3eb   :  { %v852_v60 = vadd.f32 %v851_v9, %v781_v58  ;;  %v853_v2 = vpop.f32.mrb[3].mxu1 }
 0x3ec   :  { %v854_v4 = vadd.f32 %v853_v2, %v783_v8 }
 0x3ed   :  { %v856_v61 = vsub.f32 0.0, %v852_v60 }
 0x3ee   :  { %v857_v62 = vsub.f32 0.0, %v854_v4 }
 0x3ef   :  { %v858_v63 = vmul.f32 1.442695, %v856_v61 }
 0x3f0   :  { %v860_v7 = vmul.f32 1.442695, %v857_v62 }
 0x3f1   :  { %1141 = vpow2.f32 %v858_v63 }
 0x3f2   :  { %1143 = vpow2.f32 %v860_v7 }
 0x3fb   :  { %v1142_v10 = vpop.eup %1141 }
 0x3fc   :  { %v1144_v24 = vpop.eup %1143  ;;  %v862_v17 = vadd.f32 1.0, %v1142_v10 }
 0x3fd   :  { %v863_v19 = vadd.f32 1.0, %v1144_v24 }
 0x3fe   :  { %1145 = vrcp.f32 %v862_v17 }
 0x3ff   :  { %1147 = vrcp.f32 %v863_v19 }
 0x408   :  { %v1146_v27 = vpop.eup %1145 }
 0x409   :  { %v1148_v29 = vpop.eup %1147 }
 0x40a   :  { %v870_v1 = vcombine.low %v1146_v27, %v1148_v29 }
 0x40c   :  { %v877_v32 = vrot.slane %v870_v1, %v876_v28 }
 0x40e   :  { %v878_v0 = vcombine.high %v877_v32, %v877_v32  ;;  %v885_v33 = vrot.slane %v877_v32, %v876_v28 }
 0x410   :  { %v892_v30 = vrot.slane %v878_v0, %v876_v28  ;;  %v896_v34 = vrot.slane %v885_v33, %v1599_v3  ;;  %v900_v12 = vrot.slane %v885_v33, %v1627_v31 }
 0x412   :  { %v904_v35 = vrot.slane %v892_v30, %v1599_v3  ;;  %v908_v13 = vrot.slane %v892_v30, %v1627_v31  ;;  %v913_v38 = vmul.f32 %v896_v34, %v1763_v53  ;;  %v914_v39 = vmul.f32 %v900_v12, %v1766_v57 }
 0x413   :  { %v915_v56 = vmul.f32 %v896_v34, %v1757_v52  ;;  %v916_v40 = vmul.f32 %v900_v12, %v1760_v44  ;;  %v917_v41 = vmul.f32 %v896_v34, %v1769_v55  ;;  %v918_v42 = vmul.f32 %v900_v12, %v1772_v59 }
 0x414   :  { %v919_v43 = vmul.f32 %v896_v34, %v1783_v14  ;;  %v920_v45 = vmul.f32 %v900_v12, %v1786_v15  ;;  %v921_v3 = vmul.f32 %v904_v35, %v1801_v25  ;;  %v922_v31 = vmul.f32 %v908_v13, %v1804_v18  ;;  %929 = vst [vmem:[%s1921_s7] sm:$0xff] %v913_v38 }
 0x415   :  { %930 = vst [vmem:[%s1921_s7 + $0x8] sm:$0xff] %v914_v39  ;;  %v923_v52 = vmul.f32 %v904_v35, %v1793_v11  ;;  %v924_v44 = vmul.f32 %v908_v13, %v1796_v16  ;;  %v925_v53 = vmul.f32 %v904_v35, %v1809_v5  ;;  %v926_v57 = vmul.f32 %v908_v13, %v1812_v6 }
 0x416   :  { %931 = vst [vmem:[%s1921_s7 + $0x10] sm:$0xff] %v915_v56  ;;  %932 = vst [vmem:[%s1921_s7 + $0x18] sm:$0xff] %v916_v40  ;;  %v927_v55 = vmul.f32 %v904_v35, %v1823_v36  ;;  %v928_v59 = vmul.f32 %v908_v13, %v1826_v37 }
 0x417   :  { %933 = vst [vmem:[%s1921_s7 + $0x20] sm:$0xff] %v917_v41  ;;  %934 = vst [vmem:[%s1921_s7 + $0x28] sm:$0xff] %v918_v42 }
 0x418   :  { %935 = vst [vmem:[%s1921_s7 + $0x30] sm:$0xff] %v919_v43  ;;  %936 = vst [vmem:[%s1921_s7 + $0x38] sm:$0xff] %v920_v45 }
 0x419   :  { %937 = vst [vmem:[%s1921_s7 + $0x40] sm:$0xff] %v921_v3  ;;  %938 = vst [vmem:[%s1921_s7 + $0x48] sm:$0xff] %v922_v31 }
 0x41a   :  { %939 = vst [vmem:[%s1921_s7 + $0x50] sm:$0xff] %v923_v52  ;;  %940 = vst [vmem:[%s1921_s7 + $0x58] sm:$0xff] %v924_v44 }
 0x41b   :  { %941 = vst [vmem:[%s1921_s7 + $0x60] sm:$0xff] %v925_v53  ;;  %942 = vst [vmem:[%s1921_s7 + $0x68] sm:$0xff] %v926_v57 }
 0x41c   :  { %943 = vst [vmem:[%s1921_s7 + $0x70] sm:$0xff] %v927_v55  ;;  %944 = vst [vmem:[%s1921_s7 + $0x78] sm:$0xff] %v928_v59 }

</bundles_post_ra>
